<compile_context>
chip_gen: v7x
topology: tpu7x:2x2x1
jax: 0.10.0
libtpu: 0.0.40
codegen_flags: <defaults>
</compile_context>

<pallas_src>
import functools
import math

import jax
import jax.numpy as jnp
from jax.experimental import pallas as pl
from jax.experimental.pallas import tpu as pltpu


def co_attention_kernel(s1_ref, s2_ref, mask_ref,
                        wq_ref, bq_ref, wk_ref, bk_ref, wv_ref, bv_ref,
                        o_ref, *, num_heads, head_dim):
    # Per-grid-point views (batch dim squeezed by BlockSpec):
    #   s1_ref: [Sq, H], s2_ref: [Sk, H], mask_ref: [1, Sk]
    #   w*_ref: [H, H] (pre-transposed to [in, out]), b*_ref: [1, H]
    s1 = s1_ref[...].astype(jnp.float32)
    s2 = s2_ref[...].astype(jnp.float32)
    mask = mask_ref[...].astype(jnp.float32)          # broadcast over query rows

    # Fused QKV projections — lane-dense MXU matmuls, f32 accumulation.
    q = jnp.dot(s1, wq_ref[...], preferred_element_type=jnp.float32) + bq_ref[...]
    k = jnp.dot(s2, wk_ref[...], preferred_element_type=jnp.float32) + bk_ref[...]
    v = jnp.dot(s2, wv_ref[...], preferred_element_type=jnp.float32) + bv_ref[...]

    scale = 1.0 / math.sqrt(head_dim)
    ctx_parts = []
    for h in range(num_heads):                        # static unroll over heads
        lo = h * head_dim
        hi = lo + head_dim
        qh = q[:, lo:hi]                              # [Sq, hd]
        kh = k[:, lo:hi]                              # [Sk, hd]
        vh = v[:, lo:hi]                              # [Sk, hd]
        # scores = qh @ kh^T -> [Sq, Sk]
        scores = jax.lax.dot_general(
            qh, kh, (((1,), (1,)), ((), ())),
            preferred_element_type=jnp.float32) * scale
        scores = scores + mask                        # additive attention mask
        # numerically-stable softmax over keys
        m = jnp.max(scores, axis=-1, keepdims=True)
        e = jnp.exp(scores - m)
        probs = e / jnp.sum(e, axis=-1, keepdims=True)
        # TODO(synk): training-mode attention dropout (nn.Dropout) not implemented;
        #             inference / eval mode is identity.
        ctx_parts.append(
            jnp.dot(probs, vh, preferred_element_type=jnp.float32))  # [Sq, hd]
    # Concatenate heads along the lane dim -> one full-width, lane-dense store.
    ctx = jnp.concatenate(ctx_parts, axis=-1)         # [Sq, H]
    o_ref[...] = ctx.astype(o_ref.dtype)


def bert_co_attention(s1_hidden, s2_hidden, s2_attention_mask,
                      wq, bq, wk, bk, wv, bv, *, num_attention_heads):
    """BertCoAttention.forward (inference).

    s1_hidden:          [B, Sq, H]      query stream
    s2_hidden:          [B, Sk, H]      key/value stream
    s2_attention_mask:  [B, 1, 1, Sk]   additive mask (0 attend / -1e4 masked)
    wq/wk/wv:           [H, H]          PyTorch nn.Linear layout (out, in)
    bq/bk/bv:           [H]
    returns:            [B, Sq, H]
    """
    B, Sq, H = s1_hidden.shape
    _, Sk, _ = s2_hidden.shape
    assert H % num_attention_heads == 0
    head_dim = H // num_attention_heads

    # Pre-transpose Linear weights to [in, out] so the kernel issues x @ W directly.
    wq_t, wk_t, wv_t = wq.T, wk.T, wv.T
    bq2, bk2, bv2 = bq.reshape(1, H), bk.reshape(1, H), bv.reshape(1, H)
    mask = s2_attention_mask.reshape(B, 1, Sk)

    kernel = functools.partial(co_attention_kernel,
                               num_heads=num_attention_heads, head_dim=head_dim)

    return pl.pallas_call(
        kernel,
        out_shape=jax.ShapeDtypeStruct((B, Sq, H), s1_hidden.dtype),
        grid_spec=pltpu.PrefetchScalarGridSpec(
            num_scalar_prefetch=0,
            grid=(B,),  # one step per batch row: pipelined DMA + megacore sharding
            in_specs=[
                pl.BlockSpec((None, Sq, H), lambda b: (b, 0, 0)),   # s1 tile
                pl.BlockSpec((None, Sk, H), lambda b: (b, 0, 0)),   # s2 tile
                pl.BlockSpec((None, 1, Sk), lambda b: (b, 0, 0)),   # mask tile
                pl.BlockSpec((H, H), lambda b: (0, 0)),             # Wq^T (resident)
                pl.BlockSpec((1, H), lambda b: (0, 0)),             # bq
                pl.BlockSpec((H, H), lambda b: (0, 0)),             # Wk^T
                pl.BlockSpec((1, H), lambda b: (0, 0)),             # bk
                pl.BlockSpec((H, H), lambda b: (0, 0)),             # Wv^T
                pl.BlockSpec((1, H), lambda b: (0, 0)),             # bv
            ],
            out_specs=pl.BlockSpec((None, Sq, H), lambda b: (b, 0, 0)),
        ),
        compiler_params=pltpu.CompilerParams(
            dimension_semantics=("parallel",),   # batch rows are independent
        ),
    )(s1_hidden, s2_hidden, mask, wq_t, bq2, wk_t, bk2, wv_t, bv2)


def _reference(s1, s2, mask4d, wq, bq, wk, bk, wv, bv, num_heads):
    """Pure-JAX reference matching the PyTorch module."""
    B, Sq, H = s1.shape
    Sk = s2.shape[1]
    hd = H // num_heads
    q = s1 @ wq.T + bq
    k = s2 @ wk.T + bk
    v = s2 @ wv.T + bv

    def split(x, S):
        return x.reshape(B, S, num_heads, hd).transpose(0, 2, 1, 3)

    qh, kh, vh = split(q, Sq), split(k, Sk), split(v, Sk)
    scores = jnp.einsum('bhqd,bhkd->bhqk', qh, kh) / math.sqrt(hd)
    scores = scores + mask4d
    probs = jax.nn.softmax(scores, axis=-1)
    ctx = jnp.einsum('bhqk,bhkd->bhqd', probs, vh)
    return ctx.transpose(0, 2, 1, 3).reshape(B, Sq, H)


if __name__ == "__main__":
    key = jax.random.PRNGKey(0)
    ks = jax.random.split(key, 8)

    # Small shapes consistent with the module: hidden_size=32, 4 heads (head_dim=8).
    B, Sq, Sk, H, NH = 2, 8, 16, 32, 4

    s1 = jax.random.normal(ks[0], (B, Sq, H), dtype=jnp.float32)
    s2 = jax.random.normal(ks[1], (B, Sk, H), dtype=jnp.float32)

    # Extended additive attention mask [B, 1, 1, Sk]: 0 = attend, -1e4 = masked.
    valid = jnp.ones((B, Sk), dtype=jnp.float32).at[1, -4:].set(0.0)
    mask4d = ((1.0 - valid) * -10000.0).reshape(B, 1, 1, Sk)

    wq = jax.random.normal(ks[2], (H, H), dtype=jnp.float32) * 0.05
    wk = jax.random.normal(ks[3], (H, H), dtype=jnp.float32) * 0.05
    wv = jax.random.normal(ks[4], (H, H), dtype=jnp.float32) * 0.05
    bq = jax.random.normal(ks[5], (H,), dtype=jnp.float32) * 0.05
    bk = jax.random.normal(ks[6], (H,), dtype=jnp.float32) * 0.05
    bv = jax.random.normal(ks[7], (H,), dtype=jnp.float32) * 0.05

    out = bert_co_attention(s1, s2, mask4d, wq, bq, wk, bk, wv, bv,
                            num_attention_heads=NH)
    jax.block_until_ready(out)

    ref = _reference(s1, s2, mask4d, wq, bq, wk, bk, wv, bv, NH)
    assert out.shape == (B, Sq, H)
    assert jnp.allclose(out, ref, atol=1e-4, rtol=1e-4), float(jnp.max(jnp.abs(out - ref)))

    print("KERNEL_OK")
</pallas_src>

<mosaic_0001>
module attributes {stable_mosaic.version = 11 : i64} {
  func.func @co_attention_kernel(%arg0: i32, %arg1: memref<1x8x32xf32, #tpu.memory_space<vmem>>, %arg2: memref<1x16x32xf32, #tpu.memory_space<vmem>>, %arg3: memref<1x1x16xf32, #tpu.memory_space<vmem>>, %arg4: memref<32x32xf32, #tpu.memory_space<vmem>>, %arg5: memref<1x32xf32, #tpu.memory_space<vmem>>, %arg6: memref<32x32xf32, #tpu.memory_space<vmem>>, %arg7: memref<1x32xf32, #tpu.memory_space<vmem>>, %arg8: memref<32x32xf32, #tpu.memory_space<vmem>>, %arg9: memref<1x32xf32, #tpu.memory_space<vmem>>, %arg10: memref<1x8x32xf32, #tpu.memory_space<vmem>>) attributes {dimension_semantics = [#tpu.dimension_semantics<parallel>], iteration_bounds = array<i64: 2>, scalar_prefetch = 0 : i64, scratch_operands = 0 : i64, tpu.core_type = #tpu.core_type<tc>, window_params = [{transform_indices = @transform_0, window_bounds = array<i64: 1, 8, 32>}, {transform_indices = @transform_1, window_bounds = array<i64: 1, 16, 32>}, {transform_indices = @transform_2, window_bounds = array<i64: 1, 1, 16>}, {pipeline_mode = #tpu.pipeline_mode<synchronous>, transform_indices = @transform_3, window_bounds = array<i64: 32, 32>}, {pipeline_mode = #tpu.pipeline_mode<synchronous>, transform_indices = @transform_4, window_bounds = array<i64: 1, 32>}, {pipeline_mode = #tpu.pipeline_mode<synchronous>, transform_indices = @transform_5, window_bounds = array<i64: 32, 32>}, {pipeline_mode = #tpu.pipeline_mode<synchronous>, transform_indices = @transform_6, window_bounds = array<i64: 1, 32>}, {pipeline_mode = #tpu.pipeline_mode<synchronous>, transform_indices = @transform_7, window_bounds = array<i64: 32, 32>}, {pipeline_mode = #tpu.pipeline_mode<synchronous>, transform_indices = @transform_8, window_bounds = array<i64: 1, 32>}, {transform_indices = @transform_9, window_bounds = array<i64: 1, 8, 32>}]} {
    %c0 = arith.constant 0 : index
    %c0_0 = arith.constant 0 : index
    %c0_1 = arith.constant 0 : index
    %0 = vector.load %arg1[%c0, %c0_0, %c0_1] : memref<1x8x32xf32, #tpu.memory_space<vmem>>, vector<1x8x32xf32>
    %1 = vector.shape_cast %0 : vector<1x8x32xf32> to vector<8x32xf32>
    %c0_2 = arith.constant 0 : index
    %c0_3 = arith.constant 0 : index
    %c0_4 = arith.constant 0 : index
    %2 = vector.load %arg2[%c0_2, %c0_3, %c0_4] : memref<1x16x32xf32, #tpu.memory_space<vmem>>, vector<1x16x32xf32>
    %3 = vector.shape_cast %2 : vector<1x16x32xf32> to vector<16x32xf32>
    %c0_5 = arith.constant 0 : index
    %c0_6 = arith.constant 0 : index
    %c0_7 = arith.constant 0 : index
    %4 = vector.load %arg3[%c0_5, %c0_6, %c0_7] : memref<1x1x16xf32, #tpu.memory_space<vmem>>, vector<1x1x16xf32>
    %5 = vector.shape_cast %4 : vector<1x1x16xf32> to vector<1x16xf32>
    %c0_8 = arith.constant 0 : index
    %c0_9 = arith.constant 0 : index
    %6 = vector.load %arg4[%c0_8, %c0_9] : memref<32x32xf32, #tpu.memory_space<vmem>>, vector<32x32xf32>
    %cst = arith.constant dense<0.000000e+00> : vector<8x32xf32>
    %7 = tpu.matmul %1, %6, %cst {dimension_numbers = #tpu.dot_dimension_numbers<[1], [0], [0], [1], [0, 0, 1, 1], [], []>} : vector<8x32xf32>, vector<32x32xf32>, vector<8x32xf32> -> vector<8x32xf32>
    %c0_10 = arith.constant 0 : index
    %c0_11 = arith.constant 0 : index
    %8 = vector.load %arg5[%c0_10, %c0_11] : memref<1x32xf32, #tpu.memory_space<vmem>>, vector<1x32xf32>
    %9 = vector.broadcast %8 : vector<1x32xf32> to vector<8x32xf32>
    %10 = arith.addf %7, %9 : vector<8x32xf32>
    %c0_12 = arith.constant 0 : index
    %c0_13 = arith.constant 0 : index
    %11 = vector.load %arg6[%c0_12, %c0_13] : memref<32x32xf32, #tpu.memory_space<vmem>>, vector<32x32xf32>
    %cst_14 = arith.constant dense<0.000000e+00> : vector<16x32xf32>
    %12 = tpu.matmul %3, %11, %cst_14 {dimension_numbers = #tpu.dot_dimension_numbers<[1], [0], [0], [1], [0, 0, 1, 1], [], []>} : vector<16x32xf32>, vector<32x32xf32>, vector<16x32xf32> -> vector<16x32xf32>
    %c0_15 = arith.constant 0 : index
    %c0_16 = arith.constant 0 : index
    %13 = vector.load %arg7[%c0_15, %c0_16] : memref<1x32xf32, #tpu.memory_space<vmem>>, vector<1x32xf32>
    %14 = vector.broadcast %13 : vector<1x32xf32> to vector<16x32xf32>
    %15 = arith.addf %12, %14 : vector<16x32xf32>
    %c0_17 = arith.constant 0 : index
    %c0_18 = arith.constant 0 : index
    %16 = vector.load %arg8[%c0_17, %c0_18] : memref<32x32xf32, #tpu.memory_space<vmem>>, vector<32x32xf32>
    %cst_19 = arith.constant dense<0.000000e+00> : vector<16x32xf32>
    %17 = tpu.matmul %3, %16, %cst_19 {dimension_numbers = #tpu.dot_dimension_numbers<[1], [0], [0], [1], [0, 0, 1, 1], [], []>} : vector<16x32xf32>, vector<32x32xf32>, vector<16x32xf32> -> vector<16x32xf32>
    %c0_20 = arith.constant 0 : index
    %c0_21 = arith.constant 0 : index
    %18 = vector.load %arg9[%c0_20, %c0_21] : memref<1x32xf32, #tpu.memory_space<vmem>>, vector<1x32xf32>
    %19 = vector.broadcast %18 : vector<1x32xf32> to vector<16x32xf32>
    %20 = arith.addf %17, %19 : vector<16x32xf32>
    %21 = vector.extract_strided_slice %10 {offsets = [0, 0], sizes = [8, 8], strides = [1, 1]} : vector<8x32xf32> to vector<8x8xf32>
    %22 = vector.extract_strided_slice %15 {offsets = [0, 0], sizes = [16, 8], strides = [1, 1]} : vector<16x32xf32> to vector<16x8xf32>
    %23 = vector.extract_strided_slice %20 {offsets = [0, 0], sizes = [16, 8], strides = [1, 1]} : vector<16x32xf32> to vector<16x8xf32>
    %cst_22 = arith.constant dense<0.000000e+00> : vector<8x16xf32>
    %24 = tpu.matmul %21, %22, %cst_22 {dimension_numbers = #tpu.dot_dimension_numbers<[1], [1], [0], [0], [0, 0, 1, 0], [], []>} : vector<8x8xf32>, vector<16x8xf32>, vector<8x16xf32> -> vector<8x16xf32>
    %cst_23 = arith.constant 0.353553385 : f32
    %25 = vector.broadcast %cst_23 : f32 to vector<8x16xf32>
    %26 = arith.mulf %24, %25 : vector<8x16xf32>
    %27 = vector.broadcast %5 : vector<1x16xf32> to vector<8x16xf32>
    %28 = arith.addf %26, %27 : vector<8x16xf32>
    %cst_24 = arith.constant dense<0xFF800000> : vector<8xf32>
    %29 = vector.multi_reduction <maximumf>, %28, %cst_24 [1] : vector<8x16xf32> to vector<8xf32>
    %30 = vector.shape_cast %29 : vector<8xf32> to vector<8x1xf32>
    %31 = vector.broadcast %30 : vector<8x1xf32> to vector<8x16xf32>
    %32 = arith.subf %28, %31 : vector<8x16xf32>
    %33 = math.exp %32 : vector<8x16xf32>
    %cst_25 = arith.constant dense<0.000000e+00> : vector<8xf32>
    %34 = vector.multi_reduction <add>, %33, %cst_25 [1] : vector<8x16xf32> to vector<8xf32>
    %35 = vector.shape_cast %34 : vector<8xf32> to vector<8x1xf32>
    %36 = vector.broadcast %35 : vector<8x1xf32> to vector<8x16xf32>
    %37 = arith.divf %33, %36 : vector<8x16xf32>
    %cst_26 = arith.constant dense<0.000000e+00> : vector<8x8xf32>
    %38 = tpu.matmul %37, %23, %cst_26 {dimension_numbers = #tpu.dot_dimension_numbers<[1], [0], [0], [1], [0, 0, 1, 1], [], []>} : vector<8x16xf32>, vector<16x8xf32>, vector<8x8xf32> -> vector<8x8xf32>
    %39 = vector.extract_strided_slice %10 {offsets = [0, 8], sizes = [8, 8], strides = [1, 1]} : vector<8x32xf32> to vector<8x8xf32>
    %40 = vector.extract_strided_slice %15 {offsets = [0, 8], sizes = [16, 8], strides = [1, 1]} : vector<16x32xf32> to vector<16x8xf32>
    %41 = vector.extract_strided_slice %20 {offsets = [0, 8], sizes = [16, 8], strides = [1, 1]} : vector<16x32xf32> to vector<16x8xf32>
    %cst_27 = arith.constant dense<0.000000e+00> : vector<8x16xf32>
    %42 = tpu.matmul %39, %40, %cst_27 {dimension_numbers = #tpu.dot_dimension_numbers<[1], [1], [0], [0], [0, 0, 1, 0], [], []>} : vector<8x8xf32>, vector<16x8xf32>, vector<8x16xf32> -> vector<8x16xf32>
    %cst_28 = arith.constant 0.353553385 : f32
    %43 = vector.broadcast %cst_28 : f32 to vector<8x16xf32>
    %44 = arith.mulf %42, %43 : vector<8x16xf32>
    %45 = vector.broadcast %5 : vector<1x16xf32> to vector<8x16xf32>
    %46 = arith.addf %44, %45 : vector<8x16xf32>
    %cst_29 = arith.constant dense<0xFF800000> : vector<8xf32>
    %47 = vector.multi_reduction <maximumf>, %46, %cst_29 [1] : vector<8x16xf32> to vector<8xf32>
    %48 = vector.shape_cast %47 : vector<8xf32> to vector<8x1xf32>
    %49 = vector.broadcast %48 : vector<8x1xf32> to vector<8x16xf32>
    %50 = arith.subf %46, %49 : vector<8x16xf32>
    %51 = math.exp %50 : vector<8x16xf32>
    %cst_30 = arith.constant dense<0.000000e+00> : vector<8xf32>
    %52 = vector.multi_reduction <add>, %51, %cst_30 [1] : vector<8x16xf32> to vector<8xf32>
    %53 = vector.shape_cast %52 : vector<8xf32> to vector<8x1xf32>
    %54 = vector.broadcast %53 : vector<8x1xf32> to vector<8x16xf32>
    %55 = arith.divf %51, %54 : vector<8x16xf32>
    %cst_31 = arith.constant dense<0.000000e+00> : vector<8x8xf32>
    %56 = tpu.matmul %55, %41, %cst_31 {dimension_numbers = #tpu.dot_dimension_numbers<[1], [0], [0], [1], [0, 0, 1, 1], [], []>} : vector<8x16xf32>, vector<16x8xf32>, vector<8x8xf32> -> vector<8x8xf32>
    %57 = vector.extract_strided_slice %10 {offsets = [0, 16], sizes = [8, 8], strides = [1, 1]} : vector<8x32xf32> to vector<8x8xf32>
    %58 = vector.extract_strided_slice %15 {offsets = [0, 16], sizes = [16, 8], strides = [1, 1]} : vector<16x32xf32> to vector<16x8xf32>
    %59 = vector.extract_strided_slice %20 {offsets = [0, 16], sizes = [16, 8], strides = [1, 1]} : vector<16x32xf32> to vector<16x8xf32>
    %cst_32 = arith.constant dense<0.000000e+00> : vector<8x16xf32>
    %60 = tpu.matmul %57, %58, %cst_32 {dimension_numbers = #tpu.dot_dimension_numbers<[1], [1], [0], [0], [0, 0, 1, 0], [], []>} : vector<8x8xf32>, vector<16x8xf32>, vector<8x16xf32> -> vector<8x16xf32>
    %cst_33 = arith.constant 0.353553385 : f32
    %61 = vector.broadcast %cst_33 : f32 to vector<8x16xf32>
    %62 = arith.mulf %60, %61 : vector<8x16xf32>
    %63 = vector.broadcast %5 : vector<1x16xf32> to vector<8x16xf32>
    %64 = arith.addf %62, %63 : vector<8x16xf32>
    %cst_34 = arith.constant dense<0xFF800000> : vector<8xf32>
    %65 = vector.multi_reduction <maximumf>, %64, %cst_34 [1] : vector<8x16xf32> to vector<8xf32>
    %66 = vector.shape_cast %65 : vector<8xf32> to vector<8x1xf32>
    %67 = vector.broadcast %66 : vector<8x1xf32> to vector<8x16xf32>
    %68 = arith.subf %64, %67 : vector<8x16xf32>
    %69 = math.exp %68 : vector<8x16xf32>
    %cst_35 = arith.constant dense<0.000000e+00> : vector<8xf32>
    %70 = vector.multi_reduction <add>, %69, %cst_35 [1] : vector<8x16xf32> to vector<8xf32>
    %71 = vector.shape_cast %70 : vector<8xf32> to vector<8x1xf32>
    %72 = vector.broadcast %71 : vector<8x1xf32> to vector<8x16xf32>
    %73 = arith.divf %69, %72 : vector<8x16xf32>
    %cst_36 = arith.constant dense<0.000000e+00> : vector<8x8xf32>
    %74 = tpu.matmul %73, %59, %cst_36 {dimension_numbers = #tpu.dot_dimension_numbers<[1], [0], [0], [1], [0, 0, 1, 1], [], []>} : vector<8x16xf32>, vector<16x8xf32>, vector<8x8xf32> -> vector<8x8xf32>
    %75 = vector.extract_strided_slice %10 {offsets = [0, 24], sizes = [8, 8], strides = [1, 1]} : vector<8x32xf32> to vector<8x8xf32>
    %76 = vector.extract_strided_slice %15 {offsets = [0, 24], sizes = [16, 8], strides = [1, 1]} : vector<16x32xf32> to vector<16x8xf32>
    %77 = vector.extract_strided_slice %20 {offsets = [0, 24], sizes = [16, 8], strides = [1, 1]} : vector<16x32xf32> to vector<16x8xf32>
    %cst_37 = arith.constant dense<0.000000e+00> : vector<8x16xf32>
    %78 = tpu.matmul %75, %76, %cst_37 {dimension_numbers = #tpu.dot_dimension_numbers<[1], [1], [0], [0], [0, 0, 1, 0], [], []>} : vector<8x8xf32>, vector<16x8xf32>, vector<8x16xf32> -> vector<8x16xf32>
    %cst_38 = arith.constant 0.353553385 : f32
    %79 = vector.broadcast %cst_38 : f32 to vector<8x16xf32>
    %80 = arith.mulf %78, %79 : vector<8x16xf32>
    %81 = vector.broadcast %5 : vector<1x16xf32> to vector<8x16xf32>
    %82 = arith.addf %80, %81 : vector<8x16xf32>
    %cst_39 = arith.constant dense<0xFF800000> : vector<8xf32>
    %83 = vector.multi_reduction <maximumf>, %82, %cst_39 [1] : vector<8x16xf32> to vector<8xf32>
    %84 = vector.shape_cast %83 : vector<8xf32> to vector<8x1xf32>
    %85 = vector.broadcast %84 : vector<8x1xf32> to vector<8x16xf32>
    %86 = arith.subf %82, %85 : vector<8x16xf32>
    %87 = math.exp %86 : vector<8x16xf32>
    %cst_40 = arith.constant dense<0.000000e+00> : vector<8xf32>
    %88 = vector.multi_reduction <add>, %87, %cst_40 [1] : vector<8x16xf32> to vector<8xf32>
    %89 = vector.shape_cast %88 : vector<8xf32> to vector<8x1xf32>
    %90 = vector.broadcast %89 : vector<8x1xf32> to vector<8x16xf32>
    %91 = arith.divf %87, %90 : vector<8x16xf32>
    %cst_41 = arith.constant dense<0.000000e+00> : vector<8x8xf32>
    %92 = tpu.matmul %91, %77, %cst_41 {dimension_numbers = #tpu.dot_dimension_numbers<[1], [0], [0], [1], [0, 0, 1, 1], [], []>} : vector<8x16xf32>, vector<16x8xf32>, vector<8x8xf32> -> vector<8x8xf32>
    %93 = tpu.concatenate %38, %56, %74, %92 in 1 : vector<8x8xf32>, vector<8x8xf32>, vector<8x8xf32>, vector<8x8xf32> -> vector<8x32xf32>
    %c0_42 = arith.constant 0 : index
    %c0_43 = arith.constant 0 : index
    %c0_44 = arith.constant 0 : index
    %94 = vector.load %arg10[%c0_42, %c0_43, %c0_44] : memref<1x8x32xf32, #tpu.memory_space<vmem>>, vector<1x8x32xf32>
    %95 = vector.shape_cast %94 : vector<1x8x32xf32> to vector<8x32xf32>
    %96 = vector.shape_cast %93 : vector<8x32xf32> to vector<1x8x32xf32>
    tpu.vector_store %arg10[%c0_42, %c0_43, %c0_44], %96 {strides = array<i32>} : memref<1x8x32xf32, #tpu.memory_space<vmem>>, vector<1x8x32xf32>,
    return
  }
  func.func @transform_0(%arg0: i32) -> (i32, i32, i32) {
    %c0_i32 = arith.constant 0 : i32
    %c0_i32_0 = arith.constant 0 : i32
    %c0_i32_1 = arith.constant 0 : i32
    return %arg0, %c0_i32, %c0_i32_0 : i32, i32, i32
  }
  func.func @transform_1(%arg0: i32) -> (i32, i32, i32) {
    %c0_i32 = arith.constant 0 : i32
    %c0_i32_0 = arith.constant 0 : i32
    %c0_i32_1 = arith.constant 0 : i32
    return %arg0, %c0_i32, %c0_i32_0 : i32, i32, i32
  }
  func.func @transform_2(%arg0: i32) -> (i32, i32, i32) {
    %c0_i32 = arith.constant 0 : i32
    %c0_i32_0 = arith.constant 0 : i32
    %c0_i32_1 = arith.constant 0 : i32
    return %arg0, %c0_i32, %c0_i32_0 : i32, i32, i32
  }
  func.func @transform_3(%arg0: i32) -> (i32, i32) {
    %c0_i32 = arith.constant 0 : i32
    %c0_i32_0 = arith.constant 0 : i32
    %c0_i32_1 = arith.constant 0 : i32
    return %c0_i32, %c0_i32_0 : i32, i32
  }
  func.func @transform_4(%arg0: i32) -> (i32, i32) {
    %c0_i32 = arith.constant 0 : i32
    %c0_i32_0 = arith.constant 0 : i32
    %c0_i32_1 = arith.constant 0 : i32
    return %c0_i32, %c0_i32_0 : i32, i32
  }
  func.func @transform_5(%arg0: i32) -> (i32, i32) {
    %c0_i32 = arith.constant 0 : i32
    %c0_i32_0 = arith.constant 0 : i32
    %c0_i32_1 = arith.constant 0 : i32
    return %c0_i32, %c0_i32_0 : i32, i32
  }
  func.func @transform_6(%arg0: i32) -> (i32, i32) {
    %c0_i32 = arith.constant 0 : i32
    %c0_i32_0 = arith.constant 0 : i32
    %c0_i32_1 = arith.constant 0 : i32
    return %c0_i32, %c0_i32_0 : i32, i32
  }
  func.func @transform_7(%arg0: i32) -> (i32, i32) {
    %c0_i32 = arith.constant 0 : i32
    %c0_i32_0 = arith.constant 0 : i32
    %c0_i32_1 = arith.constant 0 : i32
    return %c0_i32, %c0_i32_0 : i32, i32
  }
  func.func @transform_8(%arg0: i32) -> (i32, i32) {
    %c0_i32 = arith.constant 0 : i32
    %c0_i32_0 = arith.constant 0 : i32
    %c0_i32_1 = arith.constant 0 : i32
    return %c0_i32, %c0_i32_0 : i32, i32
  }
  func.func @transform_9(%arg0: i32) -> (i32, i32, i32) {
    %c0_i32 = arith.constant 0 : i32
    %c0_i32_0 = arith.constant 0 : i32
    %c0_i32_1 = arith.constant 0 : i32
    return %arg0, %c0_i32, %c0_i32_0 : i32, i32, i32
  }
}

</mosaic_0001>

<bundles_post_ra>
// kernel: tpu_custom_call.1
= control target key start
LH: loop header
LB: loop body
LE: loop exit
PB: predicated region body
PF: predicated region fallthrough
CT: control target
= control target key end

     0   :  { %s2664_s0 = inlined_call_operand.hbm [shape: f32[2,8,32], index: 0, kind: input, shape index: {}]   ;;  %s2665_s1 = inlined_call_operand.hbm [shape: f32[2,16,32], index: 1, kind: input, shape index: {}]   ;;  %s2666_s2 = inlined_call_operand.vmem [shape: f32[2,1,16], index: 2, kind: input, shape index: {}]   ;;  %s2667_s3 = inlined_call_operand.hbm [shape: f32[32,32], index: 3, kind: input, shape index: {}]   ;;  %s2668_s4 = inlined_call_operand.vmem [shape: f32[1,32], index: 4, kind: input, shape index: {}]   ;;  %s2669_s5 = inlined_call_operand.hbm [shape: f32[32,32], index: 5, kind: input, shape index: {}]   ;;  %s2670_s6 = inlined_call_operand.vmem [shape: f32[1,32], index: 6, kind: input, shape index: {}]   ;;  %s2671_s7 = inlined_call_operand.hbm [shape: f32[32,32], index: 7, kind: input, shape index: {}]   ;;  %s2672_s8 = inlined_call_operand.vmem [shape: f32[1,32], index: 8, kind: input, shape index: {}]   ;;  %s2673_s9 = inlined_call_operand.hbm [shape: f32[2,8,32], index: 9, kind: output, shape index: {}]  }
   0x1   :  { %2682 = sst [smem:[#allocation19_spill]] %s2664_s0 }
   0x2   :  { %2683 = sst [smem:[#allocation20_spill]] %s2667_s3 }
   0x3   :  { %2684 = sst [smem:[#allocation21_spill]] %s2673_s9 }
   0x4   :  { %14 = vsyncpa [#allocation3], 0 }
   0x5   :  { %16 = vsyncpa [#allocation3 + $0x1], 0 }
   0x6   :  { %17 = vsyncpa [#allocation6], 0 }
   0x7   :  { %19 = vsyncpa [#allocation6 + $0x1], 0 }
   0x8   :  { %20 = vsyncpa [#allocation9], 0 }
   0x9   :  { %21 = vsyncpa [#allocation4], 0 }
   0xa   :  { %23 = vsyncpa [#allocation4 + $0x1], 0  ;;  %s2228_s30 = smov 0   ;;  %s2230_s10 = smov 0  }
   0xb   :  { %s2232_s11 = smov 0   ;;  %s2234_s12 = smov 0  }
   0xc LB: > { %2685 = sst [smem:[#allocation17_spill]] %s2147_s30  ;;  %s2249_s13 = sadd.s32 4294967295, %s2159_s12   ;;  %s2159_s12 = sphi %s2234_s12, %s2715_s12   ;;  %s2155_s11 = sphi %s2232_s11, %s2714_s11   ;;  %s2151_s10 = sphi %s2230_s10, %s2713_s10   ;;  %s2147_s30 = sphi %s2228_s30, %s2712_s30  }
   0xd   : > { %s1570_s14 = sadd.s32 4294967294, %s2159_s12   ;;  %p49_p0 = scmp.ne.s32.totalorder %s2151_s10, %s2147_s30 }
   0xe   : > { %p2674_p1 = scmp.eq.s32.totalorder %s2249_s13, 0  ;;  %p257_p3 = scmp.eq.s32.totalorder %s1570_s14, 1 }
   0xf   : > { %p1571_p5 = scmp.ge.s32.totalorder %s2159_s12, 1  ;;  %p264_p7 = scmp.lt.s32.totalorder %s2159_s12, 3 }
  0x10   : > { %p2258_p4 = por %p2674_p1, %p49_p0  ;;  %p2263_p6 = por %p257_p3, %p49_p0 }
  0x11   : > { %p2268_p8 = pnand %p1571_p5, %p264_p7  ;;  %s2161_s18 = smov [#allocation7]  }
  0x12   : > { %s2686_s15 = scalar_select %p2258_p4, 1, 0 }
  0x13   : > { %s2687_s16 = scalar_select %p2263_p6, 1, 0 }
  0x14   : > { %s2689_s17 = scalar_select %p2268_p8, 1, 0 }
  0x15   : > { %2688 = sst [smem:[#allocation18_spill]] %s2687_s16  ;;  %s276_s19 = sshll.u32 %s2161_s18, 4  ;;  %s2272_s19 = int_to_ptr.vmem [resolvable:$true] %s276_s19 }
  0x16   : > { %p1816_p9 = pneg %p2268_p8  ;;  %s2162_s21 = smov [#allocation8]  }
  0x17   : > { %s292_s22 = sshll.u32 %s2162_s21, 4  ;;  %s2163_s23 = smov [#allocation10]   ;;  %s2283_s22 = int_to_ptr.vmem [resolvable:$true] %s292_s22 }
  0x18   : > { %p2279_p11 = pnand %p1816_p9, %p2674_p1  ;;  %s2285_s24 = sshll.u32 %s2163_s23, 4  ;;  %s309_s24 = int_to_ptr.vmem [resolvable:$true] %s2285_s24 }
  0x19   : > { %s2691_s3 = sld [smem:[#allocation20_spill]] }
  0x1a   : > { %p2295_p13 = pneg %p2279_p11 }
  0x1f   : > { %s1937_s27 = scalar_lea.hbm %s2691_s3, 512 }
  0x20   : > { %p1938_p12 = scmp.ne.s32.totalorder %s2691_s3, %s1937_s27  ;;  %p1944_p5 = scmp.lt.u32.totalorder %s1937_s27, %s2691_s3 }
  0x22   : > { %p1940_p0 = pnand %p2295_p13, %p1938_p12 }
  0x24   : > { %p1941_p3 = pneg %p1940_p0 }
  0x26   : > { %p1946_p7 = pnand %p1944_p5, %p1941_p3 }
  0x28   : > { %1949 = shalt.err (!%p1946_p7)
}
  0x29   : > { %s1950_s23 = scalar_lea.vmem %s2272_s19, 512  ;;  %p1958_p2 = scmp.lt.s32.totalorder %s2272_s19, %s2272_s19 }
  0x2a   : > { %p1951_p9 = scmp.ne.s32.totalorder %s2272_s19, %s1950_s23  ;;  %p1959_p6 = scmp.lt.s32.totalorder %s1950_s23, %s1950_s23 }
  0x2c   : > { %p1953_p10 = pnand %p1951_p9, %p2295_p13  ;;  %p1960_p12 = por %p1959_p6, %p1958_p2 }
  0x2e   : > { %p1954_p1 = pneg %p1953_p10 }
  0x30   : > { %p1961_p0 = pnand %p1960_p12, %p1954_p1 }
  0x32   : > { %1964 = shalt.err (!%p1961_p0)
}
  0x33   : > { %s2680_s25 = smov 128   ;;  %s2681_s26 = smov 8  }
  0x34   : > { %1819 = dma.hbm_to_vmem [thread:$0]  (!%p2279_p11), %s2691_s3, 512, %s2272_s19, [#allocation6], %s2680_s25, %s2680_s25, %s2681_s26  }
  0x35   : > { %s1965_s21 = scalar_lea.hbm %s2669_s5, 512 }
  0x36   : > { %p1966_p1 = scmp.ne.s32.totalorder %s2669_s5, %s1965_s21  ;;  %p1972_p10 = scmp.lt.u32.totalorder %s1965_s21, %s2669_s5 }
  0x38   : > { %p1968_p2 = pnand %p1966_p1, %p2295_p13 }
  0x3a   : > { %p1969_p6 = pneg %p1968_p2 }
  0x3c   : > { %p1974_p3 = pnand %p1972_p10, %p1969_p6 }
  0x3e   : > { %1977 = shalt.err (!%p1974_p3)
}
  0x3f   : > { %s1978_s19 = scalar_lea.vmem %s2283_s22, 512  ;;  %p1986_p12 = scmp.lt.s32.totalorder %s2283_s22, %s2283_s22 }
  0x40   : > { %p1979_p5 = scmp.ne.s32.totalorder %s2283_s22, %s1978_s19  ;;  %p1987_p0 = scmp.lt.s32.totalorder %s1978_s19, %s1978_s19 }
  0x42   : > { %p1981_p7 = pnand %p1979_p5, %p2295_p13  ;;  %p1988_p1 = por %p1987_p0, %p1986_p12 }
  0x44   : > { %p1982_p9 = pneg %p1981_p7 }
  0x46   : > { %p1989_p2 = pnand %p1988_p1, %p1982_p9 }
  0x48   : > { %1992 = shalt.err (!%p1989_p2)
}
  0x49   : > { %1822 = dma.hbm_to_vmem [thread:$0]  (!%p2279_p11), %s2669_s5, 512, %s2283_s22, [#allocation9], %s2680_s25, %s2680_s25, %s2681_s26  }
  0x4a   : > { %s1993_s28 = scalar_lea.hbm %s2671_s7, 512 }
  0x4b   : > { %p1994_p6 = scmp.ne.s32.totalorder %s2671_s7, %s1993_s28  ;;  %p2000_p5 = scmp.lt.u32.totalorder %s1993_s28, %s2671_s7 }
  0x4d   : > { %p1996_p10 = pnand %p1994_p6, %p2295_p13 }
  0x4f   : > { %p1997_p3 = pneg %p1996_p10 }
  0x51   : > { %p2002_p7 = pnand %p2000_p5, %p1997_p3 }
  0x53   : > { %2005 = shalt.err (!%p2002_p7)
}
  0x54   : > { %s2006_s19 = scalar_lea.vmem %s309_s24, 512  ;;  %p2014_p1 = scmp.lt.s32.totalorder %s309_s24, %s309_s24 }
  0x55   : > { %p2007_p9 = scmp.ne.s32.totalorder %s309_s24, %s2006_s19  ;;  %p2015_p2 = scmp.lt.s32.totalorder %s2006_s19, %s2006_s19 }
  0x57   : > { %p2009_p12 = pnand %p2007_p9, %p2295_p13  ;;  %p2016_p4 = por %p2015_p2, %p2014_p1 }
  0x59   : > { %p2010_p0 = pneg %p2009_p12 }
  0x5b   : > { %p2017_p8 = pnand %p2016_p4, %p2010_p0 }
  0x5d   : > { %2020 = shalt.err (!%p2017_p8)
}
  0x5e   : > { %1825 = dma.hbm_to_vmem [thread:$0]  (!%p2279_p11), %s2671_s7, 512, %s309_s24, [#allocation9], %s2680_s25, %s2680_s25, %s2681_s26  }
  0x5f   : > { %s2368_s14 = sadd.s32 1, %s2159_s12   ;;  %s36_s30 = sadd.s32 1, %s2155_s11 }
  0x60   : > { %s33_s20 = ssub.s32 %s2159_s12, %s2368_s14  ;;  %p43_p8 = scmp.ne.s32.totalorder %s2155_s11, %s2151_s10 }
  0x61   : > { %p34_p4 = scmp.eq.s32.totalorder %s33_s20, 0  ;;  %p44_p13 = scmp.eq.s32.totalorder %s2159_s12, 0 }
  0x62   : > { %p1840_p6 = scmp.lt.s32.totalorder %s2159_s12, 2  ;;  %p2693_p3 = scmp.eq.s32.totalorder %s2249_s13, 1 }
  0x63   : > { %s2378_s16 = scalar_select %p34_p4, %s2155_s11, %s36_s30  }
  0x64   : > { %p45_p10 = por %p44_p13, %p43_p8  ;;  %p2382_p5 = por %p2693_p3, %p43_p8 }
  0x65   : > { %s2387_s28 = sand.u32 1, %s2155_s11   ;;  %s1577_s24 = sshll.u32 %s2159_s12, 7 }
  0x66   : > { %s1576_s29 = sshll.u32 %s2387_s28, 3  ;;  %s2695_s0 = sld [smem:[#allocation19_spill]] }
  0x67   : > { %s329_s19 = scalar_lea.vmem [#allocation2], %s1576_s29  ;;  %p2396_p11 = pnand %p1840_p6, %p45_p10 }
  0x68   : > { %s336_s22 = sshll.u32 %s329_s19, 4  ;;  %s1578_s20 = sshll.u32 %s2387_s28, 4  ;;  %s2400_s22 = int_to_ptr.vmem [resolvable:$true] %s336_s22 }
  0x69   : > { %s326_s30 = scalar_lea.sflag [#allocation3], %s2387_s28  ;;  %p2023_p9 = pneg %p2396_p11 }
  0x6c   : > { %s2394_s23 = scalar_lea.hbm %s2695_s0, %s1577_s24  ;;  %s2026_s18 = scalar_lea.hbm %s2695_s0, 256 }
  0x6d   : > { %s2021_s25 = scalar_lea.hbm %s2394_s23, 128  ;;  %p2027_p1 = scmp.lt.u32.totalorder %s2394_s23, %s2695_s0 }
  0x6e   : > { %p2022_p7 = scmp.ne.s32.totalorder %s2394_s23, %s2021_s25  ;;  %p2028_p2 = scmp.lt.u32.totalorder %s2026_s18, %s2021_s25 }
  0x6f   : > { %p2030_p8 = scmp.lt.u32.totalorder %s2021_s25, %s2394_s23 }
  0x70   : > { %p2024_p12 = pnand %p2023_p9, %p2022_p7  ;;  %p2029_p4 = por %p2028_p2, %p2027_p1 }
  0x72   : > { %p2025_p0 = pneg %p2024_p12  ;;  %p2031_p13 = por %p2030_p8, %p2029_p4 }
  0x74   : > { %p2032_p6 = pnand %p2031_p13, %p2025_p0 }
  0x76   : > { %2035 = shalt.err (!%p2032_p6)
}
  0x77   : > { %s2036_s26 = scalar_lea.vmem %s2400_s22, 128  ;;  %s2166_s24 = smov [#allocation2]  }
  0x78   : > { %p2037_p10 = scmp.ne.s32.totalorder %s2400_s22, %s2036_s26  ;;  %s2041_s29 = sshll.u32 %s2166_s24, 4  ;;  %s2042_s29 = int_to_ptr.vmem [resolvable:$false] %s2041_s29 }
  0x79   : > { %s2043_s21 = scalar_lea.vmem %s2042_s29, 256  ;;  %p2044_p12 = scmp.lt.s32.totalorder %s2400_s22, %s2042_s29 }
  0x7a   : > { %p2039_p3 = pnand %p2037_p10, %p2023_p9  ;;  %p2045_p1 = scmp.lt.s32.totalorder %s2043_s21, %s2036_s26 }
  0x7c   : > { %p2040_p7 = pneg %p2039_p3  ;;  %p2046_p2 = por %p2045_p1, %p2044_p12 }
  0x7e   : > { %p2047_p4 = pnand %p2046_p2, %p2040_p7 }
  0x80   : > { %2050 = shalt.err (!%p2047_p4)
}
  0x81   : > { %1829 = dma.hbm_to_vmem [thread:$0]  (!%p2396_p11), %s2394_s23, 128, %s2400_s22, %s326_s30  }
  0x82   : > { %s347_s25 = scalar_lea.vmem [#allocation5], %s1578_s20  ;;  %s343_s19 = sand.u32 1, %s2159_s12  }
  0x83   : > { %s354_s18 = sshll.u32 %s347_s25, 4  ;;  %s1617_s24 = sshll.u32 %s2159_s12, 8  ;;  %s2432_s18 = int_to_ptr.vmem [resolvable:$true] %s354_s18 }
  0x84   : > { %s2438_s21 = scalar_lea.hbm %s2665_s1, %s1617_s24  ;;  %s2440_s0 = scalar_lea.sflag [#allocation6], %s343_s19 }
  0x85   : > { %s2051_s3 = scalar_lea.hbm %s2438_s21, 256  ;;  %s2056_s22 = scalar_lea.hbm %s2665_s1, 512 }
  0x86   : > { %p2052_p0 = scmp.ne.s32.totalorder %s2438_s21, %s2051_s3  ;;  %p2057_p6 = scmp.lt.u32.totalorder %s2438_s21, %s2665_s1 }
  0x87   : > { %p2058_p10 = scmp.lt.u32.totalorder %s2056_s22, %s2051_s3  ;;  %p2060_p7 = scmp.lt.u32.totalorder %s2051_s3, %s2438_s21 }
  0x88   : > { %p2054_p8 = pnand %p2052_p0, %p2023_p9 }
  0x89   : > { %p2059_p3 = por %p2058_p10, %p2057_p6 }
  0x8a   : > { %p2055_p13 = pneg %p2054_p8 }
  0x8b   : > { %p2061_p12 = por %p2060_p7, %p2059_p3 }
  0x8d   : > { %p2062_p1 = pnand %p2061_p12, %p2055_p13 }
  0x8f   : > { %2065 = shalt.err (!%p2062_p1)
}
  0x90   : > { %s2066_s25 = scalar_lea.vmem %s2432_s18, 256  ;;  %s2167_s19 = smov [#allocation5]  }
  0x91   : > { %p2067_p2 = scmp.ne.s32.totalorder %s2432_s18, %s2066_s25  ;;  %s2071_s24 = sshll.u32 %s2167_s19, 4  ;;  %s2072_s24 = int_to_ptr.vmem [resolvable:$false] %s2071_s24 }
  0x92   : > { %s2073_s26 = scalar_lea.vmem %s2072_s24, 512  ;;  %p2074_p8 = scmp.lt.s32.totalorder %s2432_s18, %s2072_s24 }
  0x93   : > { %p2069_p4 = pnand %p2067_p2, %p2023_p9  ;;  %p2075_p6 = scmp.lt.s32.totalorder %s2073_s26, %s2066_s25 }
  0x95   : > { %p2070_p0 = pneg %p2069_p4  ;;  %p2076_p10 = por %p2075_p6, %p2074_p8 }
  0x97   : > { %p2077_p3 = pnand %p2076_p10, %p2070_p0 }
  0x99   : > { %2080 = shalt.err (!%p2077_p3)
}
  0x9a   : > { %s2697_s3 = smov 8   ;;  %s2698_s29 = smov 128  }
  0x9b   : > { %1832 = dma.hbm_to_vmem [thread:$0]  (!%p2396_p11), %s2438_s21, 256, %s2432_s18, %s2440_s0, %s2698_s29, %s2698_s29, %s2697_s3  }
  0x9c   : > { %p2699_p9 = scmp.ne.s32.totalorder %s2689_s17, 0 }
  0x9d   : > { %s2472_s28 = sand.u32 (!%p2699_p9), 1, %s2151_s10   ;;  %p2700_p13 = scmp.ne.s32.totalorder (!%p2699_p9), %s2686_s15, 0 }
  0x9e   : > { %372 = sbr.rel (%p2699_p9) target bundleno = 2479 (0x9af), region = 56  ;;  %s1582_s23 = sshll.u32 (!%p2699_p9), %s2472_s28, 3 }
  0x9f   : > { %s375_s22 = scalar_lea.sflag (!%p2699_p9), [#allocation3], %s2472_s28  ;;  %s2478_s9 = scalar_lea.vmem (!%p2699_p9), [#allocation2], %s1582_s23 }
  0xa5   : > { %2126 = dma.done.wait (%p2700_p13), %s375_s22, 128  }
  0xa6   : > { %2128 = vsyncadd (%p2700_p13), %s375_s22, 4294967168  ;;  %s383_s0 = sand.u32 1, %s2249_s13   ;;  %s1583_s17 = sshll.u32 %s2472_s28, 4 }
  0xa7   : > { %s384_s18 = scalar_lea.sflag [#allocation6], %s383_s0  ;;  %s2486_s21 = scalar_lea.vmem [#allocation5], %s1583_s17 }
  0xa8   : > { %2130 = dma.done.wait (%p2700_p13), %s384_s18, 256  }
  0xa9   : > { %2132 = vsyncadd (%p2700_p13), %s384_s18, 4294967040  ;;  %p2701_p11 = scmp.eq.s32.totalorder %s2249_s13, 0 }
  0xab   : > { %2134 = dma.done.wait (%p2701_p11), [#allocation6], 512   ;;  %p2702_p7 = pmov %p2701_p11 }
  0xad   : > { %2136 = vsyncadd (%p2702_p7), [#allocation6], 4294966784  ;;  %p2703_p12 = pmov %p2702_p7 }
  0xae   : > { %p2704_p1 = pmov %p2702_p7 }
  0xaf   : > { %2138 = dma.done.wait (%p2703_p12), [#allocation9], 1024  }
  0xb0   : > { %2140 = vsyncadd (%p2704_p1), [#allocation9], 4294966272  ;;  %v2168_v0 = vmov 0.0|0.0   ;;  %vm2169_vm0 = vmmov 0   ;;  %v2170_v1 = vmov 0.0   ;;  %vm460_vm1 = vcmask 261120  }
  0xb1   : > { %1748 = vmatprep.subr.bf16.mxu0 %v2168_v0  ;;  %1667 = vmatprep.mubr.msk.f32.mxu0 %vm2169_vm0, %v2170_v1  ;;  %v534_v2 = vld [vmem:[#allocation8] sm:$0xff]  ;;  %v535_v3 = vld [vmem:[#allocation8 + $0x8] sm:$0xff]  ;;  %v536_v4 = vld [vmem:[#allocation8 + $0x10] sm:$0xff]  ;;  %vm712_vm2 = vcmask 64512   ;;  %s2171_s19 = smov 120   ;;  %p442_p2 = scmp.lt.s32.totalorder %s2249_s13, 1 }
  0xb2   : > { %v1754_v5 = vpack.c.bf16 %v535_v3, %v534_v2  ;;  %v537_v6 = vld [vmem:[#allocation8 + $0x18] sm:$0xff]  ;;  %v446_v7 = vld [vmem:[%s2486_s21] sm:$0xff]  ;;  %v450_v10 = vld [vmem:[#allocation7 + $0x8] sm:$0xff]  ;;  %vm800_vm4 = vcmask 130048   ;;  %s2172_s0 = smov 112   ;;  %s2173_s17 = smov 104  }
  0xb3   : > { %v1758_v8 = vpack.c.bf16 %v537_v6, %v536_v4  ;;  %1678 = vmatprep.mubr.msk.f32.mxu1 %vm460_vm1, %v446_v7  ;;  %v449_v9 = vld [vmem:[#allocation7] sm:$0xff]  ;;  %v451_v11 = vld [vmem:[#allocation7 + $0x10] sm:$0xff]  ;;  %v452_v13 = vld [vmem:[#allocation7 + $0x18] sm:$0xff]  ;;  %s443_s24 = scalar_select %p442_p2, %s2249_s13, 1  ;;  %vm1423_vm5 = vcmask 195584  }
  0xb4   : > { %1755 = vmatprep.subr.bf16.mxu1 %v1754_v5  ;;  %v1749_v12 = vpack.c.bf16 %v450_v10, %v449_v9  ;;  %v1752_v14 = vpack.c.bf16 %v452_v13, %v451_v11  ;;  %v447_v15 = vld [vmem:[%s2486_s21 + $0x8] sm:$0xff]  ;;  %v1590_v17 = vld [vmem:[%s2670_s6] ss:$0 sm:$0xff]  ;;  %vm2519_vm3 = vmpackc.low %vm712_vm2, %vm712_vm2  ;;  %s2174_s18 = smov 8   ;;  %s2175_s21 = smov 16  }
  0xb5   : > { %1757 = vmatpush3.bf16.msra.mxu1 %v1754_v5  ;;  %v445_v16 = vld [vmem:[%s2478_s9] sm:$0xff]  ;;  %v626_v27 = vld [vmem:[#allocation10] sm:$0xff]  ;;  %v627_v28 = vld [vmem:[#allocation10 + $0x8] sm:$0xff]  ;;  %s444_s29 = scalar_lea.vmem %s2666_s2, %s443_s24  ;;  %s2176_s15 = smov 24  }
  0xb6   : > { %1759 = vmatprep.subr.bf16.mxu1 %v1758_v8  ;;  %1750 = vmatpush3.bf16.msra.mxu0 %v1749_v12  ;;  %v628_v29 = vld [vmem:[#allocation10 + $0x10] sm:$0xff]  ;;  %v1762_v31 = vpack.c.bf16 %v627_v28, %v626_v27  ;;  %v629_v32 = vld [vmem:[#allocation10 + $0x18] sm:$0xff]  ;;  %s1614_s20 = sshll.u32 %s2249_s13, 7  ;;  %s441_s30 = scalar_lea.vmem [#allocation11], %s1582_s23 }
  0xb7   : > { %1751 = vmatprep.subr.bf16.mxu0 %v2168_v0  ;;  %v1588_v30 = vld [vmem:[%s2668_s4] ss:$0 sm:$0xff]  ;;  %v1766_v33 = vpack.c.bf16 %v629_v32, %v628_v29  ;;  %s1440_s25 = sshll.u32 %s441_s30, 4  ;;  %s2707_s26 = sld [smem:[#allocation21_spill]]  ;;  %s2621_s25 = int_to_ptr.vmem [resolvable:$true] %s1440_s25 }
  0xb8   : > { %v2556_v41 = vld [vmem:[%s444_s29] ss:$0 sm:$0xff]  ;;  %s1427_s13 = scalar_lea.sflag [#allocation4], %s2472_s28  ;;  %s2081_s23 = scalar_lea.vmem %s2621_s25, 128 }
  0xb9   : > { %1761 = vmatpush3.bf16.msra.mxu1 %v1758_v8  ;;  %v1593_v48 = vld [vmem:[%s2672_s8] ss:$0 sm:$0xff]  ;;  %p2082_p4 = scmp.ne.s32.totalorder %s2621_s25, %s2081_s23  ;;  %s2177_s29 = smov [#allocation11]  }
  0xba   : > { %1753 = vmatpush3.bf16.msra.mxu0 %v1752_v14  ;;  %1770 = vmatprep.subr.bf16.mxu1 %v2168_v0  ;;  %s2085_s22 = sshll.u32 %s2177_s29, 4  ;;  %s2086_s22 = int_to_ptr.vmem [resolvable:$false] %s2085_s22 }
  0xbb   : > { %1763 = vmatprep.subr.bf16.mxu0 %v1762_v31  ;;  %p2083_p0 = pnand %p2082_p4, %p2382_p5  ;;  %s2087_s9 = scalar_lea.vmem %s2086_s22, 256 }
  0xbc   : > { %1679 = vmatmul.mubr.msk.f32.vlgmr.msra.gmra.mrb[0].mxu1 %vm460_vm1, %v447_v15  ;;  %p2088_p6 = scmp.lt.s32.totalorder %s2621_s25, %s2086_s22  ;;  %p2089_p10 = scmp.lt.s32.totalorder %s2087_s9, %s2081_s23 }
  0xbd   : > { %1668 = vmatmul.mubr.msk.f32.vlgmr.msra.gmra.mrb[0].mxu0 %vm460_vm1, %v445_v16  ;;  %1696 = vmatprep.mubr.msk.f32.mxu1 %vm2169_vm0, %v2170_v1  ;;  %s2619_s3 = scalar_lea.hbm %s2707_s26, %s1614_s20  ;;  %p2084_p8 = pneg %p2083_p0 }
  0xbe   : > { %1689 = vmatprep.mubr.msk.f32.mxu0 %vm460_vm1, %v446_v7  ;;  %1765 = vmatpush3.bf16.msra.mxu0 %v1762_v31  ;;  %p2090_p3 = por %p2089_p10, %p2088_p6 }
  0xbf   : > { %1767 = vmatprep.subr.bf16.mxu0 %v1766_v33 }
  0xc0   : > { %p2091_p9 = pnand %p2090_p3, %p2084_p8 }
  0xc2   : > { %1769 = vmatpush3.bf16.msra.mxu0 %v1766_v33 }
  0xc3   : > { %1774 = vmatprep.subr.bf16.mxu0 %v2168_v0 }
  0xc5   : > { %1690 = vmatmul.mubr.msk.f32.vlgmr.msra.gmra.mrb[2].mxu0 %vm460_vm1, %v447_v15 }
  0xc6   : > { %1703 = vmatprep.mubr.msk.f32.mxu0 %vm2169_vm0, %v2170_v1 }
 0x18f   : > { %v1680_v18 = vpop.f32.mrb[0].mxu1 }
 0x190   : > { %v623_v19 = vadd.f32 %v1680_v18, %v1590_v17  ;;  %v617_v20 = vpop.f32.mrb[1].mxu1  ;;  %v530_v21 = vpop.f32.mrb[0].mxu0 }
 0x191   : > { %v618_v22 = vadd.f32 %v1590_v17, %v617_v20  ;;  %v1669_v23 = vpop.f32.mrb[1].mxu0  ;;  %v2533_v34 = vadd.f32 %v1588_v30, %v530_v21 }
 0x193   : > { %v1771_v25 = vpack.c.bf16 %v623_v19, %v618_v22  ;;  %v2523_v26 = vpack.i.bf16 %v623_v19, %v618_v22 }
 0x195   : > { %1892 = vrot.lane.b32.xlu0 %v2523_v26, %s2171_s19  ;;  %1773 = vmatpush3.bf16.xpose.msk.msra.mxu1 %vm2519_vm3, %v1771_v25 }
 0x196   : > { %1777 = vmatprep.subr.bf16.mxu1 %v2168_v0 }
 0x198   : > { %v1691_v44 = vpop.f32.mrb[2].mxu0 }
 0x199   : > { %885 = vrot.lane.b32.xlu0 %v2533_v34, %s2171_s19  ;;  %v703_v46 = vpop.f32.mrb[3].mxu0  ;;  %v709_v49 = vadd.f32 %v1691_v44, %v1593_v48 }
 0x19a   : > { %v704_v50 = vadd.f32 %v1593_v48, %v703_v46 }
 0x19c   : > { %1697 = vmatmul.mubr.msk.f32.vlgmr.msra.gmra.mrb[2].mxu1 %vm712_vm2, %v2533_v34  ;;  %v1775_v51 = vpack.c.bf16 %v709_v49, %v704_v50  ;;  %v2566_v57 = vpack.i.bf16 %v709_v49, %v704_v50 }
 0x19d   : > { %1710 = vmatprep.mubr.msk.f32.mxu1 %vm2169_vm0, %v2170_v1 }
 0x19e   : > { %1776 = vmatpush3.bf16.msra.mxu0 %v1775_v51 }
 0x19f   : > { %1781 = vmatprep.subr.bf16.mxu0 %v2168_v0 }
 0x207   : > { %v1893_v35 = vpop.permute.xlu0 %1892 }
 0x208   : > { %v1895_v36 = vunpack.i.h.bf16 %v1893_v35  ;;  %v1894_v37 = vunpack.i.l.bf16 %v1893_v35 }
 0x20a   : > { %v1778_v38 = vpack.c.bf16 %v1895_v36, %v1894_v37 }
 0x20b   : > { %v886_v39 = vpop.permute.xlu0 %885 }
 0x20c   : > { %1780 = vmatpush3.bf16.xpose.msk.msra.mxu1 %vm2519_vm3, %v1778_v38 }
 0x20d   : > { %1788 = vmatprep.subr.bf16.mxu1 %v2168_v0 }
 0x213   : > { %1711 = vmatmul.mubr.msk.f32.vlgmr.msra.gmra.mrb[4].mxu1 %vm712_vm2, %v886_v39 }
 0x214   : > { %1731 = vmatprep.mubr.msk.f32.mxu1 %vm2169_vm0, %v2170_v1 }
 0x26f   : > { %v788_v40 = vpop.f32.mrb[2].mxu1 }
 0x270   : > { %v792_v42 = vmul.f32 0.35355338, %v788_v40  ;;  %v1698_v43 = vpop.f32.mrb[3].mxu1 }
 0x272   : > { %v799_v45 = vadd.f32 %v2556_v41, %v792_v42 }
 0x274   : > { %v801_v47 = vsel %vm800_vm4, %v799_v45, -inf }
 0x275   : > { %802 = vmax.xlane.f32.xlu1 %v801_v47 }
 0x2e6   : > { %v963_v52 = vpop.f32.mrb[4].mxu1 }
 0x2e7   : > { %v967_v53 = vmul.f32 0.35355338, %v963_v52  ;;  %v1712_v54 = vpop.f32.mrb[5].mxu1 }
 0x2e9   : > { %v968_v55 = vadd.f32 %v2556_v41, %v967_v53 }
 0x2eb   : > { %v969_v56 = vsel %vm800_vm4, %v968_v55, -inf }
 0x2ec   : > { %970 = vmax.xlane.f32.xlu1 %v969_v56 }
 0x2fd   : > { %1897 = vrot.lane.b32.xlu1 %v2566_v57, %s2171_s19 }
 0x301   : > { %1902 = vrot.lane.b32.xlu1 %v2523_v26, %s2172_s0 }
 0x302   : > { %v803_v58 = vpop.xlane.xlu1 %802 }
 0x303   : > { %v804_v59 = vsub.f32 %v799_v45, %v803_v58 }
 0x305   : > { %v805_v60 = vmul.f32 1.442695, %v804_v59 }
 0x307   : > { %1921 = vpow2.f32 %v805_v60 }
 0x311   : > { %v1922_v61 = vpop.eup %1921 }
 0x312   : > { %v807_v62 = vsel %vm800_vm4, %v1922_v61, 0.0 }
 0x313   : > { %808 = vadd.xlane.f32.xlu0 %v807_v62 }
 0x329   : > { %1907 = vrot.lane.b32.xlu0 %v2566_v57, %s2172_s0 }
 0x379   : > { %v971_v63 = vpop.xlane.xlu1 %970 }
 0x37a   : > { %v972_v2 = vsub.f32 %v968_v55, %v971_v63 }
 0x37c   : > { %v973_v3 = vmul.f32 1.442695, %v972_v2 }
 0x37d   : > { %v1898_v10 = vpop.permute.xlu1 %1897 }
 0x37e   : > { %1923 = vpow2.f32 %v973_v3  ;;  %v1900_v11 = vunpack.i.h.bf16 %v1898_v10  ;;  %v1899_v12 = vunpack.i.l.bf16 %v1898_v10 }
 0x380   : > { %v1782_v15 = vpack.c.bf16 %v1900_v11, %v1899_v12 }
 0x381   : > { %v1903_v17 = vpop.permute.xlu1 %1902 }
 0x382   : > { %v1905_v19 = vunpack.i.h.bf16 %v1903_v17  ;;  %v1904_v20 = vunpack.i.l.bf16 %v1903_v17 }
 0x384   : > { %v1785_v23 = vpack.c.bf16 %v1905_v19, %v1904_v20 }
 0x388   : > { %v1924_v4 = vpop.eup %1923 }
 0x389   : > { %v975_v5 = vsel %vm800_vm4, %v1924_v4, 0.0 }
 0x38a   : > { %976 = vadd.xlane.f32.xlu1 %v975_v5 }
 0x39b   : > { %1061 = vrot.lane.b32.xlu1 %v2533_v34, %s2172_s0 }
 0x3a0   : > { %v809_v6 = vpop.xlane.xlu0 %808 }
 0x3a1   : > { %1925 = vrcp.f32 %v809_v6 }
 0x3a4   : > { %v1908_v7 = vpop.permute.xlu0 %1907 }
 0x3a5   : > { %v1910_v8 = vunpack.i.h.bf16 %v1908_v7  ;;  %v1909_v9 = vunpack.i.l.bf16 %v1908_v7 }
 0x3a7   : > { %v1789_v13 = vpack.c.bf16 %v1910_v8, %v1909_v9 }
 0x3a9   : > { %1790 = vmatpush3.bf16.msra.mxu1 %v1789_v13 }
 0x3aa   : > { %1791 = vmatprep.subr.bf16.mxu1 %v2168_v0 }
 0x3ab   : > { %v1926_v14 = vpop.eup %1925 }
 0x3ac   : > { %v811_v16 = vmul.f32 %v1926_v14, %v1922_v61 }
 0x3ae   : > { %1704 = vmatmul.mubr.msk.f32.vlgmr.msra.gmra.mrb[4].mxu0 %vm800_vm4, %v811_v16 }
 0x3af   : > { %1783 = vmatpush3.bf16.msra.mxu0 %v1782_v15  ;;  %1717 = vmatprep.mubr.msk.f32.mxu0 %vm2169_vm0, %v2170_v1 }
 0x3b0   : > { %1784 = vmatprep.subr.bf16.mxu0 %v2168_v0 }
 0x417   : > { %v977_v18 = vpop.xlane.xlu1 %976 }
 0x418   : > { %1927 = vrcp.f32 %v977_v18 }
 0x41b   : > { %v1062_v25 = vpop.permute.xlu1 %1061 }
 0x422   : > { %v1928_v21 = vpop.eup %1927 }
 0x423   : > { %v979_v22 = vmul.f32 %v1928_v21, %v1924_v4 }
 0x425   : > { %1718 = vmatmul.mubr.msk.f32.vlgmr.msra.gmra.mrb[6].mxu0 %vm800_vm4, %v979_v22 }
 0x426   : > { %1787 = vmatpush3.bf16.xpose.msk.msra.mxu0 %vm2519_vm3, %v1785_v23  ;;  %1724 = vmatprep.mubr.msk.f32.mxu0 %vm2169_vm0, %v2170_v1 }
 0x427   : > { %1795 = vmatprep.subr.bf16.mxu0 %v2168_v0 }
 0x42d   : > { %1725 = vmatmul.mubr.msk.f32.vlgmr.msra.gmra.mrb[8].mxu0 %vm712_vm2, %v1062_v25 }
 0x42e   : > { %1745 = vmatprep.mubr.msk.f32.mxu0 %vm2169_vm0, %v2170_v1 }
 0x481   : > { %v2589_v27 = vpop.f32.mrb[4].mxu0 }
 0x482   : > { %v1705_v28 = vpop.f32.mrb[5].mxu0 }
 0x4f8   : > { %v1057_v29 = vpop.f32.mrb[6].mxu0 }
 0x4f9   : > { %v1719_v30 = vpop.f32.mrb[7].mxu0 }
 0x500   : > { %v1139_v31 = vpop.f32.mrb[8].mxu0 }
 0x501   : > { %v1143_v32 = vmul.f32 0.35355338, %v1139_v31  ;;  %v1726_v33 = vpop.f32.mrb[9].mxu0 }
 0x503   : > { %v1144_v35 = vadd.f32 %v2556_v41, %v1143_v32 }
 0x505   : > { %v1145_v36 = vsel %vm800_vm4, %v1144_v35, -inf }
 0x506   : > { %1146 = vmax.xlane.f32.xlu1 %v1145_v36 }
 0x593   : > { %v1147_v0 = vpop.xlane.xlu1 %1146 }
 0x594   : > { %v1148_v37 = vsub.f32 %v1144_v35, %v1147_v0 }
 0x596   : > { %v1149_v38 = vmul.f32 1.442695, %v1148_v37 }
 0x598   : > { %1929 = vpow2.f32 %v1149_v38 }
 0x5a2   : > { %v1930_v39 = vpop.eup %1929 }
 0x5a3   : > { %v1151_v40 = vsel %vm800_vm4, %v1930_v39, 0.0 }
 0x5a4   : > { %1152 = vadd.xlane.f32.xlu0 %v1151_v40 }
 0x5ba   : > { %1912 = vrot.lane.b32.xlu0 %v2523_v26, %s2173_s17 }
 0x5be   : > { %1235 = vrot.lane.b32.xlu0 %v2533_v34, %s2173_s17 }
 0x631   : > { %v1153_v42 = vpop.xlane.xlu0 %1152 }
 0x632   : > { %1931 = vrcp.f32 %v1153_v42 }
 0x635   : > { %v1913_v43 = vpop.permute.xlu0 %1912 }
 0x636   : > { %v1915_v44 = vunpack.i.h.bf16 %v1913_v43  ;;  %v1914_v45 = vunpack.i.l.bf16 %v1913_v43 }
 0x638   : > { %v1792_v48 = vpack.c.bf16 %v1915_v44, %v1914_v45 }
 0x639   : > { %v1236_v26 = vpop.permute.xlu0 %1235 }
 0x63c   : > { %v1932_v46 = vpop.eup %1931 }
 0x63d   : > { %v1155_v47 = vmul.f32 %v1932_v46, %v1930_v39 }
 0x63f   : > { %1732 = vmatmul.mubr.msk.f32.vlgmr.msra.gmra.mrb[6].mxu1 %vm800_vm4, %v1155_v47 }
 0x640   : > { %1794 = vmatpush3.bf16.xpose.msk.msra.mxu1 %vm2519_vm3, %v1792_v48  ;;  %1738 = vmatprep.mubr.msk.f32.mxu1 %vm2169_vm0, %v2170_v1 }
 0x647   : > { %1739 = vmatmul.mubr.msk.f32.vlgmr.msra.gmra.mrb[8].mxu1 %vm712_vm2, %v1236_v26 }
 0x712   : > { %v1231_v34 = vpop.f32.mrb[6].mxu1 }
 0x713   : > { %v1733_v49 = vpop.f32.mrb[7].mxu1 }
 0x71a   : > { %v1313_v50 = vpop.f32.mrb[8].mxu1 }
 0x71b   : > { %v1317_v51 = vmul.f32 0.35355338, %v1313_v50  ;;  %v1740_v52 = vpop.f32.mrb[9].mxu1 }
 0x71d   : > { %v1318_v53 = vadd.f32 %v2556_v41, %v1317_v51 }
 0x71f   : > { %v1319_v54 = vsel %vm800_vm4, %v1318_v53, -inf }
 0x720   : > { %1320 = vmax.xlane.f32.xlu0 %v1319_v54 }
 0x7ad   : > { %v1321_v55 = vpop.xlane.xlu0 %1320 }
 0x7ae   : > { %v1322_v56 = vsub.f32 %v1318_v53, %v1321_v55 }
 0x7b0   : > { %v1323_v24 = vmul.f32 1.442695, %v1322_v56 }
 0x7b2   : > { %1933 = vpow2.f32 %v1323_v24 }
 0x7bc   : > { %v1934_v58 = vpop.eup %1933 }
 0x7bd   : > { %v1325_v1 = vsel %vm800_vm4, %v1934_v58, 0.0 }
 0x7be   : > { %1326 = vadd.xlane.f32.xlu1 %v1325_v1 }
 0x7cf   : > { %1917 = vrot.lane.b32.xlu1 %v2566_v57, %s2173_s17 }
 0x7d3   : > { %1410 = vrot.lane.b32.xlu1 %v1057_v29, %s2174_s18 }
 0x7d7   : > { %1414 = vrot.lane.b32.xlu1 %v1231_v34, %s2175_s21 }
 0x84b   : > { %v1327_v59 = vpop.xlane.xlu1 %1326 }
 0x84c   : > { %1935 = vrcp.f32 %v1327_v59 }
 0x84f   : > { %v1918_v41 = vpop.permute.xlu1 %1917 }
 0x850   : > { %v1920_v60 = vunpack.i.h.bf16 %v1918_v41  ;;  %v1919_v61 = vunpack.i.l.bf16 %v1918_v41 }
 0x852   : > { %v1796_v62 = vpack.c.bf16 %v1920_v60, %v1919_v61 }
 0x853   : > { %v1411_v4 = vpop.permute.xlu1 %1410 }
 0x854   : > { %1797 = vmatpush3.bf16.msra.mxu0 %v1796_v62  ;;  %v1421_v6 = vsel %vm712_vm2, %v2589_v27, %v1411_v4 }
 0x856   : > { %v1936_v63 = vpop.eup %1935 }
 0x857   : > { %v1329_v2 = vmul.f32 %v1936_v63, %v1934_v58  ;;  %v1415_v5 = vpop.permute.xlu1 %1414 }
 0x858   : > { %v1422_v7 = vsel %vm800_vm4, %v1421_v6, %v1415_v5 }
 0x859   : > { %1746 = vmatmul.mubr.msk.f32.vlgmr.msra.gmra.mrb[10].mxu0 %vm800_vm4, %v1329_v2 }
 0x92c   : > { %v1405_v3 = vpop.f32.mrb[10].mxu0 }
 0x92d   : > { %1418 = vrot.lane.b32.xlu1 %v1405_v3, %s2176_s15  ;;  %v1747_v57 = vpop.f32.mrb[11].mxu0 }
 0x99f   : > { %v1419_v8 = vpop.permute.xlu1 %1418 }
 0x9a0   : > { %v1424_v9 = vsel %vm1423_vm5, %v1422_v7, %v1419_v8 }
 0x9a1   : > { %1425 = vst.msk [vmem:[%s441_s30] sm:$0xff] %vm460_vm1, %v1424_v9 }
 0x9a2   : > { %2094 = shalt.err (!%p2091_p9)
}
 0x9a3   : > { %s2095_s28 = scalar_lea.hbm %s2619_s3, 128  ;;  %s2099_s18 = scalar_lea.hbm %s2707_s26, 256 }
 0x9a4   : > { %p2096_p13 = scmp.ne.s32.totalorder %s2619_s3, %s2095_s28  ;;  %p2100_p12 = scmp.lt.u32.totalorder %s2619_s3, %s2707_s26 }
 0x9a5   : > { %p2101_p1 = scmp.lt.u32.totalorder %s2099_s18, %s2095_s28  ;;  %p2103_p4 = scmp.lt.u32.totalorder %s2095_s28, %s2619_s3 }
 0x9a6   : > { %p2097_p11 = pnand %p2096_p13, %p2382_p5 }
 0x9a7   : > { %p2102_p2 = por %p2101_p1, %p2100_p12 }
 0x9a8   : > { %p2098_p7 = pneg %p2097_p11 }
 0x9a9   : > { %p2104_p0 = por %p2103_p4, %p2102_p2 }
 0x9ab   : > { %p2105_p8 = pnand %p2104_p0, %p2098_p7 }
 0x9ad   : > { %2108 = shalt.err (!%p2105_p8)
}
 0x9ae   : > { %1814 = dma.vmem_to_hbm [thread:$0]  (%p2382_p5), %s2621_s25, 128, %s2619_s3, %s1427_s13  }
 0x9af PF: > { %s2708_s20 = sld [smem:[#allocation17_spill]]  ;;  %s2709_s30 = sld [smem:[#allocation18_spill]] }
 0x9b0   : > { %p2711_p10 = scmp.ge.s32.totalorder %s2159_s12, 2 }
 0x9b5   : > { %s1452_s19 = sand.u32 1, %s2708_s20   ;;  %p2710_p6 = scmp.ne.s32.totalorder %s2709_s30, 0 }
 0x9b6   : > { %s1453_s24 = scalar_lea.sflag [#allocation4], %s1452_s19 }
 0x9b7   : > { %p1834_p3 = pnand %p2711_p10, %p2710_p6 }
 0x9b9   : > { %2142 = dma.done.wait (!%p1834_p3), %s1453_s24, 128  }
 0x9ba   : > { %2144 = vsyncadd (!%p1834_p3), %s1453_s24, 4294967168  ;;  %p26_p9 = scmp.ge.s32.totalorder %s2368_s14, 4   ;;  %s2712_s30 = smov %s2151_s10 }
 0x9bb   : > { %s2713_s10 = smov %s2155_s11  ;;  %s2714_s11 = smov %s2378_s16 }
 0x9bc   : > { %s2715_s12 = smov %s2368_s14  ;;  %28 = sbr.rel (!%p26_p9) target bundleno = 12 (0xc), region = 129 }
 0x9c3   :  { %1458 = vsyncpa [#allocation3], 1 }
 0x9c4   :  { %1460 = vsyncpa [#allocation3 + $0x1], 1 }
 0x9c5   :  { %1461 = vsyncpa [#allocation6], 1 }
 0x9c6   :  { %1463 = vsyncpa [#allocation6 + $0x1], 1 }
 0x9c7   :  { %1464 = vsyncpa [#allocation9], 1 }
 0x9c8   :  { %1465 = vsyncpa [#allocation4], 1 }
 0x9c9   :  { %1467 = vsyncpa [#allocation4 + $0x1], 1 }

</bundles_post_ra>
